<compile_context>
chip_gen: v7x
topology: tpu7x:2x2x1
jax: 0.10.0
libtpu: 0.0.40
codegen_flags: <defaults>
</compile_context>

<pallas_src>
import jax
import jax.numpy as jnp
from jax.experimental import pallas as pl
from jax.experimental.pallas import tpu as pltpu


def _lockdrop_kernel(mask_ref, x_ref, o_ref):
    # mask_ref: (1, N) f32, VMEM-resident (constant block index).
    # x_ref / o_ref: (tT, N) streaming tiles; multiply broadcasts over sublanes.
    o_ref[...] = (x_ref[...] * mask_ref[...]).astype(o_ref.dtype)


def lockdrop(x, key, *, p=0.5, training=True, donate_x=False):
    """Locked (variational) dropout.  x: (T, B, H) -> mask(1,B,H)/(1-p) * x."""
    if not training or p == 0.0:
        return x
    if not (0.0 <= p < 1.0):
        # Guard: p -> 1.0 gives 1/(1-p) -> inf (PyTorch silently makes NaNs).
        raise ValueError(f"LockDrop p must be in [0, 1), got {p}")

    T, B, H = x.shape
    N = B * H
    keep_prob = 1.0 - p

    # Locked (B, H) mask, generated once.  Kept in f32 so the 1/(1-p) scale is
    # exact; the cast back to x.dtype happens after the multiply in-kernel
    # (free — the kernel is HBM-bandwidth bound).
    keep = jax.random.bernoulli(key, keep_prob, (B, H))
    mask2d = (keep.astype(jnp.float32) / jnp.float32(keep_prob)).reshape(1, N)

    # Lane-dense 2D slab: (T, B*H).  Reshape is free (contiguous, row-major).
    x2d = x.reshape(T, N)

    itemsize = jnp.dtype(x.dtype).itemsize
    sublane = max(8, 32 // itemsize)        # 8 f32, 16 bf16, 32 int8/fp8
    bytes_per_row = N * itemsize

    # Tile sizing: <= ~8 MiB per streamed tile (v7x 64 MiB VMEM budget with
    # double-buffered in+out), >= ~1 MiB when possible, and aim for ~8 grid
    # steps so DMA pipelining and v7x dual-TC sharding both have work.
    rows_8mib = max(1, (8 << 20) // max(1, bytes_per_row))
    rows_1mib = max(1, (1 << 20) // max(1, bytes_per_row))
    tT = min(rows_8mib, max(rows_1mib, pl.cdiv(T, 8)))
    tT = min(tT, T)
    if tT < T:
        # Keep the sublane dim a multiple of the dtype tile -> unmasked,
        # vreg-aligned DMAs/stores (the (8,128) BlockSpec rule); the lane dim
        # is always the full N so it never triggers the constraint.
        tT = min(T, max(sublane, (tT // sublane) * sublane))
    grid = (pl.cdiv(T, tT),)

    kwargs = {}
    if donate_x:
        # Output aliases x (input index 1): no second full-size HBM buffer
        # when the caller donates x under jit.
        kwargs["input_output_aliases"] = {1: 0}

    out2d = pl.pallas_call(
        _lockdrop_kernel,
        out_shape=jax.ShapeDtypeStruct((T, N), x.dtype),
        grid=grid,
        in_specs=[
            pl.BlockSpec((1, N), lambda t: (0, 0)),     # mask: VMEM-resident
            pl.BlockSpec((tT, N), lambda t: (t, 0)),    # x: streamed over T
        ],
        out_specs=pl.BlockSpec((tT, N), lambda t: (t, 0)),
        compiler_params=pltpu.CompilerParams(
            dimension_semantics=("parallel",),
            vmem_limit_bytes=48 << 20,
        ),
        **kwargs,
    )(mask2d, x2d)

    return out2d.reshape(T, B, H)


if __name__ == "__main__":
    key = jax.random.PRNGKey(0)
    x_key, mask_key = jax.random.split(key)

    T, B, H = 8, 4, 32
    p = 0.5
    x = jax.random.normal(x_key, (T, B, H), dtype=jnp.float32)

    out = jax.block_until_ready(lockdrop(x, mask_key, p=p, training=True))

    # Sanity: every element is either dropped (0) or scaled by 1/(1-p).
    scaled = x / (1.0 - p)
    ok_vals = jnp.all(jnp.isclose(out, 0.0) | jnp.isclose(out, scaled))
    # Sanity: mask is locked (identical) across the time axis.
    mask_t = jnp.where(jnp.isclose(out, 0.0), 0.0, 1.0)
    ok_locked = jnp.all(mask_t == mask_t[0:1])
    # Eval mode passes input through untouched.
    ok_eval = jnp.array_equal(lockdrop(x, mask_key, p=p, training=False), x)

    assert bool(ok_vals) and bool(ok_locked) and bool(ok_eval)
    print("KERNEL_OK")
</pallas_src>

<mosaic_0001>
module attributes {stable_mosaic.version = 11 : i64} {
  func.func @_lockdrop_kernel(%arg0: i32, %arg1: memref<1x128xf32, #tpu.memory_space<vmem>>, %arg2: memref<8x128xf32, #tpu.memory_space<vmem>>, %arg3: memref<8x128xf32, #tpu.memory_space<vmem>>) attributes {dimension_semantics = [#tpu.dimension_semantics<parallel>], iteration_bounds = array<i64: 1>, scalar_prefetch = 0 : i64, scratch_operands = 0 : i64, tpu.core_type = #tpu.core_type<tc>, window_params = [{pipeline_mode = #tpu.pipeline_mode<synchronous>, transform_indices = @transform_0, window_bounds = array<i64: 1, 128>}, {transform_indices = @transform_1, window_bounds = array<i64: 8, 128>}, {transform_indices = @transform_2, window_bounds = array<i64: 8, 128>}]} {
    %c0 = arith.constant 0 : index
    %c0_0 = arith.constant 0 : index
    %0 = vector.load %arg2[%c0, %c0_0] : memref<8x128xf32, #tpu.memory_space<vmem>>, vector<8x128xf32>
    %c0_1 = arith.constant 0 : index
    %c0_2 = arith.constant 0 : index
    %1 = vector.load %arg1[%c0_1, %c0_2] : memref<1x128xf32, #tpu.memory_space<vmem>>, vector<1x128xf32>
    %2 = vector.broadcast %1 : vector<1x128xf32> to vector<8x128xf32>
    %3 = arith.mulf %0, %2 : vector<8x128xf32>
    %c0_3 = arith.constant 0 : index
    %c0_4 = arith.constant 0 : index
    %4 = vector.load %arg3[%c0_3, %c0_4] : memref<8x128xf32, #tpu.memory_space<vmem>>, vector<8x128xf32>
    tpu.vector_store %arg3[%c0_3, %c0_4], %3 {strides = array<i32>} : memref<8x128xf32, #tpu.memory_space<vmem>>, vector<8x128xf32>,
    return
  }
  func.func @transform_0(%arg0: i32) -> (i32, i32) {
    %c0_i32 = arith.constant 0 : i32
    %c0_i32_0 = arith.constant 0 : i32
    %c0_i32_1 = arith.constant 0 : i32
    return %c0_i32, %c0_i32_0 : i32, i32
  }
  func.func @transform_1(%arg0: i32) -> (i32, i32) {
    %c0_i32 = arith.constant 0 : i32
    %c0_i32_0 = arith.constant 0 : i32
    return %arg0, %c0_i32 : i32, i32
  }
  func.func @transform_2(%arg0: i32) -> (i32, i32) {
    %c0_i32 = arith.constant 0 : i32
    %c0_i32_0 = arith.constant 0 : i32
    return %arg0, %c0_i32 : i32, i32
  }
}

</mosaic_0001>

<bundles_post_ra>
// kernel: tpu_custom_call.1
= control target key start
LH: loop header
LB: loop body
LE: loop exit
PB: predicated region body
PF: predicated region fallthrough
CT: control target
= control target key end

     0   :  { %7 = vsyncpa [#allocation3], 0  ;;  %s192_s0 = inlined_call_operand.hbm [shape: f32[1,128], index: 0, kind: input, shape index: {}]   ;;  %s193_s1 = inlined_call_operand.hbm [shape: f32[8,128], index: 1, kind: input, shape index: {}]   ;;  %s194_s2 = inlined_call_operand.hbm [shape: f32[8,128], index: 2, kind: output, shape index: {}]  }
   0x1   :  { %8 = vsyncpa [#allocation6], 0 }
   0x2   :  { %9 = vsyncpa [#allocation4], 0  ;;  %s138_s9 = smov [#allocation2]   ;;  %s139_s11 = smov [#allocation5]  }
   0x3   :  { %s16_s10 = sshll.u32 %s138_s9, 4  ;;  %s26_s12 = sshll.u32 %s139_s11, 4  ;;  %s17_s10 = int_to_ptr.vmem [resolvable:$true] %s16_s10  ;;  %s27_s12 = int_to_ptr.vmem [resolvable:$true] %s26_s12 }
   0x4   :  { %s66_s15 = scalar_lea.hbm %s192_s0, 16 }
   0x5   :  { %p67_p0 = scmp.ne.s32.totalorder %s192_s0, %s66_s15  ;;  %p70_p1 = scmp.lt.u32.totalorder %s66_s15, %s192_s0 }
   0x7   :  { %p72_p2 = pnand %p70_p1, %p67_p0 }
   0x9   :  { %75 = shalt.err (!%p72_p2)
}
   0xa   :  { %s76_s20 = scalar_lea.vmem %s17_s10, 16  ;;  %s80_s21 = scalar_lea.vmem %s17_s10, 32 }
   0xb   :  { %p77_p3 = scmp.ne.s32.totalorder %s17_s10, %s76_s20  ;;  %p81_p4 = scmp.lt.s32.totalorder %s17_s10, %s17_s10 }
   0xc   :  { %p82_p5 = scmp.lt.s32.totalorder %s80_s21, %s76_s20 }
   0xe   :  { %p83_p6 = por %p82_p5, %p81_p4 }
  0x10   :  { %p84_p7 = pnand %p83_p6, %p77_p3 }
  0x12   :  { %87 = shalt.err (!%p84_p7)
}
  0x13   :  { %19 = dma.hbm_to_vmem [thread:$0]  %s192_s0, 16, %s17_s10, [#allocation3]  }
  0x14   :  { %s88_s26 = scalar_lea.hbm %s193_s1, 128 }
  0x15   :  { %p89_p8 = scmp.ne.s32.totalorder %s193_s1, %s88_s26  ;;  %p92_p9 = scmp.lt.u32.totalorder %s88_s26, %s193_s1 }
  0x17   :  { %p94_p10 = pnand %p92_p9, %p89_p8 }
  0x19   :  { %97 = shalt.err (!%p94_p10)
}
  0x1a   :  { %s98_s3 = scalar_lea.vmem %s27_s12, 128  ;;  %p103_p12 = scmp.lt.s32.totalorder %s27_s12, %s27_s12 }
  0x1b   :  { %p99_p11 = scmp.ne.s32.totalorder %s27_s12, %s98_s3  ;;  %p104_p13 = scmp.lt.s32.totalorder %s98_s3, %s98_s3 }
  0x1d   :  { %p105_p0 = por %p104_p13, %p103_p12 }
  0x1f   :  { %p106_p1 = pnand %p105_p0, %p99_p11 }
  0x21   :  { %109 = shalt.err (!%p106_p1)
}
  0x22   :  { %29 = dma.hbm_to_vmem [thread:$0]  %s193_s1, 128, %s27_s12, [#allocation6]  }
  0x23   :  { %132 = dma.done.wait [#allocation3], 16  }
  0x24   :  { %133 = vsyncadd [#allocation3], 4294967280 }
  0x25   :  { %134 = dma.done.wait [#allocation6], 128  }
  0x26   :  { %135 = vsyncadd [#allocation6], 4294967168  ;;  %s140_s5 = smov [#allocation7]   ;;  %v36_v0 = vld [vmem:[#allocation5] sm:$0xff]  ;;  %v62_v1 = vld [vmem:[#allocation2] ss:$0 sm:$0xff] }
  0x27   :  { %s52_s6 = sshll.u32 %s140_s5, 4  ;;  %v44_v2 = vmul.f32 %v62_v1, %v36_v0  ;;  %s53_s6 = int_to_ptr.vmem [resolvable:$true] %s52_s6 }
  0x28   :  { %s110_s7 = scalar_lea.vmem %s53_s6, 128  ;;  %p115_p3 = scmp.lt.s32.totalorder %s53_s6, %s53_s6 }
  0x29   :  { %45 = vst [vmem:[#allocation7] sm:$0xff] %v44_v2  ;;  %p111_p2 = scmp.ne.s32.totalorder %s53_s6, %s110_s7  ;;  %p116_p4 = scmp.lt.s32.totalorder %s110_s7, %s110_s7 }
  0x2b   :  { %p117_p5 = por %p116_p4, %p115_p3 }
  0x2d   :  { %p118_p6 = pnand %p117_p5, %p111_p2 }
  0x2f   :  { %121 = shalt.err (!%p118_p6)
}
  0x30   :  { %s122_s9 = scalar_lea.hbm %s194_s2, 128 }
  0x31   :  { %p123_p7 = scmp.ne.s32.totalorder %s194_s2, %s122_s9  ;;  %p126_p8 = scmp.lt.u32.totalorder %s122_s9, %s194_s2 }
  0x33   :  { %p128_p9 = pnand %p126_p8, %p123_p7 }
  0x35   :  { %131 = shalt.err (!%p128_p9)
}
  0x36   :  { %55 = dma.vmem_to_hbm [thread:$0]  %s53_s6, 128, %s194_s2, [#allocation4]  }
  0x37   :  { %136 = dma.done.wait [#allocation4], 128  }
  0x38   :  { %137 = vsyncadd [#allocation4], 4294967168 }
  0x39   :  { %59 = vsyncpa [#allocation3], 1 }
  0x3a   :  { %60 = vsyncpa [#allocation6], 1 }
  0x3b   :  { %61 = vsyncpa [#allocation4], 1 }

</bundles_post_ra>
